<compile_context>
chip_gen: v7x
topology: tpu7x:2x2x1
jax: 0.10.0
libtpu: 0.0.40
codegen_flags: <defaults>
</compile_context>

<pallas_src>
import jax
import jax.numpy as jnp
from jax.experimental import pallas as pl
from jax.experimental.pallas import tpu as pltpu


def _return_n_kernel(n_ref, o_ref):
    # Pure SMEM scalar copy: o <- n.
    o_ref[0] = n_ref[0]


@jax.jit
def submodule_forward(n_arr: jax.Array) -> jax.Array:
    """Equivalent of Submodule(n).forward(): returns the stored constant `n`.

    `n_arr` is a shape-(1,) int32 array holding the module attribute; the
    result is a 0-d int32 array, mirroring `return self.n`.
    """
    out = pl.pallas_call(
        _return_n_kernel,
        out_shape=jax.ShapeDtypeStruct((1,), jnp.int32),
        in_specs=[pl.BlockSpec(memory_space=pltpu.MemorySpace.SMEM)],
        out_specs=pl.BlockSpec(memory_space=pltpu.MemorySpace.SMEM),
    )(n_arr)
    # Fused squeeze (stays inside the same jit program — no extra dispatch).
    return out[0]


if __name__ == "__main__":
    # Deterministic "parameter": the integer attribute n.  (PRNGKey kept only
    # for harness convention; n itself is a fixed module attribute.)
    _ = jax.random.PRNGKey(0)
    n = 42

    # Module attribute as a device scalar holder (int32 matches the original
    # integer attribute for any value in int32 range).
    n_arr = jnp.asarray([n], dtype=jnp.int32)

    result = submodule_forward(n_arr)
    result = jax.block_until_ready(result)

    assert int(result) == n, f"expected {n}, got {int(result)}"
    print("KERNEL_OK")
</pallas_src>

<mosaic_0001>
module attributes {stable_mosaic.version = 11 : i64} {
  func.func @_return_n_kernel(%arg0: memref<1xi32, #tpu.memory_space<smem>>, %arg1: memref<1xi32, #tpu.memory_space<smem>>) attributes {dimension_semantics = [], scalar_prefetch = 0 : i64, scratch_operands = 0 : i64, tpu.core_type = #tpu.core_type<tc>} {
    %c0 = arith.constant 0 : index
    %0 = memref.load %arg0[%c0] : memref<1xi32, #tpu.memory_space<smem>>
    %c0_0 = arith.constant 0 : index
    %1 = memref.load %arg1[%c0_0] : memref<1xi32, #tpu.memory_space<smem>>
    memref.store %0, %arg1[%c0_0] : memref<1xi32, #tpu.memory_space<smem>>
    return
  }
}

</mosaic_0001>

<bundles_post_ra>
// kernel: submodule_forward.1
= control target key start
LH: loop header
LB: loop body
LE: loop exit
PB: predicated region body
PF: predicated region fallthrough
CT: control target
= control target key end

     0   :  { %7 = vsyncpa [#allocation4], 0  ;;  %s65_s0 = inlined_call_operand.<no memory space> [shape: s32[1], index: 0, kind: input, shape index: {}]   ;;  %s66_s1 = inlined_call_operand.hbm [shape: s32[1], index: 1, kind: output, shape index: {}]  }
   0x1   :  { %12 = sst [smem:[#allocation3]] %s65_s0  ;;  %s27_s10 = scalar_lea.hbm %s66_s1, 16 }
   0x2   :  { %p28_p0 = scmp.ne.s32.totalorder %s66_s1, %s27_s10  ;;  %p31_p1 = scmp.lt.u32.totalorder %s27_s10, %s66_s1 }
   0x4   :  { %p33_p2 = pnand %p31_p1, %p28_p0 }
   0x6   :  { %36 = shalt.err (!%p33_p2)
}
   0x7   :  { %s39_s15 = smov [#allocation3]  }
   0x8   :  { %20 = dma.smem_to_hbm %s39_s15, 16, %s66_s1, [#allocation4]  }
   0x9   :  { %37 = dma.done.wait [#allocation4], 16  }
   0xa   :  { %38 = vsyncadd [#allocation4], 4294967280 }
   0xb   :  { %24 = sfence }
   0xc   :  { %25 = vsyncpa [#allocation4], 1 }

</bundles_post_ra>
